<compile_context>
chip_gen: v7x
topology: tpu7x:2x2x1
jax: 0.10.0
libtpu: 0.0.40
codegen_flags: <defaults>
</compile_context>

<pallas_src>
import functools

import numpy as np
import jax
import jax.numpy as jnp
from jax import lax
from jax.experimental import pallas as pl
from jax.experimental.pallas import tpu as pltpu

# --- Gaussian filter of e2cnn.PointwiseMaxPoolAntialiased (sigma=0.6) -------
SIGMA = 0.6
FSIZE = 2 * int(round(4 * SIGMA)) + 1                      # = 5
_g = np.exp(-((np.arange(FSIZE) - (FSIZE - 1) / 2.0) ** 2) / (2 * SIGMA ** 2))
GAUSS_1D = (_g / _g.sum()).astype(np.float32)              # separable 1-D Gaussian


# ----------------------------- Pallas kernel --------------------------------
def _downconv_kernel(x_ref, t1_ref, b1_ref, t2_ref, b2_ref, a_ref, bex_ref,
                     xout_ref, pout_ref, *, B, H, Cout, W2):
    H2 = H - 4                       # per-image conv2 output rows
    Hp = (H2 - 2) // 2 + 1           # per-image anti-aliased pool output rows
    BH = B * H
    M1 = BH - 2                      # tall conv1 rows (incl. cross-image junk)
    M2 = BH - 4                      # tall conv2 rows
    W2C = W2 * Cout                  # real (unpadded) lane width of conv2 output

    x = x_ref[...]                                               # (B*H, W*Cin) bf16

    # ---- conv1 (3x3, valid) + bias + ReLU : ONE fused-K MXU matmul ----
    xk = jnp.concatenate([x[0:M1], x[1:1 + M1], x[2:2 + M1]], axis=1)
    h1 = jnp.dot(xk, t1_ref[...], preferred_element_type=jnp.float32)
    h1 = jnp.maximum(h1 + b1_ref[...], 0.0).astype(t2_ref.dtype)  # (M1, NC1) bf16

    # ---- conv2 (3x3, valid) + bias + ReLU ----
    h1k = jnp.concatenate([h1[0:M2], h1[1:1 + M2], h1[2:2 + M2]], axis=1)
    h2 = jnp.dot(h1k, t2_ref[...], preferred_element_type=jnp.float32)
    h2 = jnp.maximum(h2 + b2_ref[...], 0.0)                       # (M2, NC2) f32

    # ---- X_full: per-image valid rows (junk boundary rows are skipped) ----
    for b in range(B):
        xout_ref[b, :, :] = h2[b * H:b * H + H2, :]

    # ---- dense 2x2 max pool, stride 1 (real data in lanes [0, W2*Cout)) ----
    mc = jnp.maximum(h2[:, :W2C - Cout], h2[:, Cout:W2C])         # horizontal pair
    m = jnp.maximum(mc[0:M2 - 1], mc[1:M2]).astype(a_ref.dtype)   # vertical pair

    # ---- anti-aliasing: separable 5x5 Gaussian blur (pad 2), stride 2 ----
    # row blur: block-diagonal per image (junk rows carry zero weight) ...
    tmp = jnp.dot(a_ref[...], m, preferred_element_type=jnp.float32)
    # ... column blur on the flattened (W, C) lane axis, lane-padded output.
    pool = jnp.dot(tmp.astype(bex_ref.dtype), bex_ref[...],
                   preferred_element_type=jnp.float32)            # (B*Hp, NCP)
    for b in range(B):
        pout_ref[b, :, :] = pool[b * Hp:(b + 1) * Hp, :]


# ------------------------- parameter re-packing (glue) ----------------------
def _round_up(x, m):
    return (x + m - 1) // m * m


@functools.lru_cache(maxsize=None)
def _toeplitz_indices(cin, cout, w_in, in_lanes, out_lanes):
    """int32 gather map (3*in_lanes, out_lanes) from flattened OIHW 3x3 weights
    (with one trailing zero appended) into the fused-K, lane-padded Toeplitz
    matrix for the (rows, W*C) layout.  Depends on shapes only (cached)."""
    w_out = w_in - 2
    sentinel = cout * cin * 9                       # index of the appended zero
    idx = np.full((3 * in_lanes, out_lanes), sentinel, np.int32)
    for di in range(3):
        for wc in range(w_out):
            for dj in range(3):
                for ci in range(cin):
                    row = di * in_lanes + (wc + dj) * cin + ci
                    for co in range(cout):
                        idx[row, wc * cout + co] = ((co * cin + ci) * 3 + di) * 3 + dj
    return idx


@functools.lru_cache(maxsize=None)
def _blur_1d_matrix(n_in):
    """(n_out, n_in): 1-D Gaussian blur, zero pad FSIZE//2, stride 2."""
    pad = FSIZE // 2
    n_out = (n_in + 2 * pad - FSIZE) // 2 + 1
    a = np.zeros((n_out, n_in), np.float32)
    for p in range(n_out):
        for i in range(n_in):
            u = i + pad - 2 * p
            if 0 <= u < FSIZE:
                a[p, i] = GAUSS_1D[u]
    return a


@functools.lru_cache(maxsize=None)
def _row_blur_tall(b, h):
    """(b*hp, b*h-5): per-image Gaussian row blur + stride 2 on the tall
    max-pool output; cross-image junk rows get zero weight."""
    hm = h - 5
    a_img = _blur_1d_matrix(hm)                     # (hp, hm)
    hp = a_img.shape[0]
    a = np.zeros((b * hp, b * h - 5), np.float32)
    for bi in range(b):
        a[bi * hp:(bi + 1) * hp, bi * h:bi * h + hm] = a_img
    return a


@functools.lru_cache(maxsize=None)
def _col_blur_matrix(wm, cout, out_lanes):
    """(wm*cout, out_lanes): per-channel column blur + stride 2 on the flattened
    (W, C) lane axis, zero-padded to a lane-dense (multiple-of-128) output."""
    # TODO(synk): kron(blur, I_C) carries a Cout-fold redundancy on the MXU and
    # O(Cout^2) VMEM; at large Cout replace with a W-only contraction.
    bc = _blur_1d_matrix(wm)                        # (wp, wm)
    wp = bc.shape[0]
    m = np.zeros((wm * cout, out_lanes), np.float32)
    m[:, :wp * cout] = np.kron(bc.T, np.eye(cout, dtype=np.float32))
    return m


def _pick_block_batch(n, h, max_b=8):
    """Images folded into one grid step (fattens the MXU M dim; kept modest)."""
    for b in range(min(n, max_b), 0, -1):
        if n % b == 0 and (b == n or (b * h) % 16 == 0):
            return b
    return n


# ------------------------------- wrapper -------------------------------------
def downconv_forward(x_nchw, w1, b1, w2, b2, *, block_batch=None):
    n, cin, h, w = x_nchw.shape
    cout = w1.shape[0]
    w1o, w2o = w - 2, w - 4
    h2o = h - 4
    hm, wm = h2o - 1, w2o - 1                 # dense (stride-1) max-pool size
    hp = (hm - 1) // 2 + 1                    # anti-aliased pool output size
    wp = (wm - 1) // 2 + 1
    nc1 = _round_up(w1o * cout, 128)          # lane-padded conv1 width
    nc2 = _round_up(w2o * cout, 128)          # lane-padded conv2 width
    ncp = _round_up(wp * cout, 128)           # lane-padded pool width
    bb = block_batch or _pick_block_batch(n, h)

    # glue: NCHW -> channels-last (W,C) lanes, batch folded into rows ("tall image")
    x_tall = (jnp.transpose(x_nchw, (0, 2, 3, 1))
              .reshape(n * h, w * cin).astype(jnp.bfloat16))

    # fused-K, lane-padded Toeplitz conv weights via gather (jit/grad friendly).
    t1 = jnp.concatenate([w1.reshape(-1), jnp.zeros((1,), w1.dtype)])[
        _toeplitz_indices(cin, cout, w, w * cin, nc1)].astype(jnp.bfloat16)
    t2 = jnp.concatenate([w2.reshape(-1), jnp.zeros((1,), w2.dtype)])[
        _toeplitz_indices(cout, cout, w1o, nc1, nc2)].astype(jnp.bfloat16)
    b1p = jnp.pad(jnp.tile(b1.astype(jnp.float32), w1o),
                  (0, nc1 - w1o * cout)).reshape(1, nc1)
    b2p = jnp.pad(jnp.tile(b2.astype(jnp.float32), w2o),
                  (0, nc2 - w2o * cout)).reshape(1, nc2)
    a_tall = jnp.asarray(_row_blur_tall(bb, h), jnp.bfloat16)        # (bb*hp, bb*h-5)
    bex = jnp.asarray(_col_blur_matrix(wm, cout, ncp), jnp.bfloat16)  # (wm*cout, ncp)

    kernel = functools.partial(_downconv_kernel, B=bb, H=h, Cout=cout, W2=w2o)

    x_out, pool = pl.pallas_call(
        kernel,
        out_shape=(
            jax.ShapeDtypeStruct((n, h2o, nc2), jnp.float32),
            jax.ShapeDtypeStruct((n, hp, ncp), jnp.float32),
        ),
        grid=(n // bb,),
        in_specs=[
            pl.BlockSpec((bb * h, w * cin), lambda i: (i, 0)),
            pl.BlockSpec((3 * w * cin, nc1), lambda i: (0, 0)),
            pl.BlockSpec((1, nc1), lambda i: (0, 0)),
            pl.BlockSpec((3 * nc1, nc2), lambda i: (0, 0)),
            pl.BlockSpec((1, nc2), lambda i: (0, 0)),
            pl.BlockSpec((bb * hp, bb * h - 5), lambda i: (0, 0)),
            pl.BlockSpec((wm * cout, ncp), lambda i: (0, 0)),
        ],
        out_specs=(
            pl.BlockSpec((bb, h2o, nc2), lambda i: (i, 0, 0)),
            pl.BlockSpec((bb, hp, ncp), lambda i: (i, 0, 0)),
        ),
        compiler_params=pltpu.CompilerParams(
            dimension_semantics=("parallel",),
            vmem_limit_bytes=32 * 1024 * 1024,
        ),
    )(x_tall, t1, b1p, t2, b2p, a_tall, bex)

    # glue: strip lane padding, back to NCHW (PyTorch convention)
    x_full = jnp.transpose(
        x_out[:, :, :w2o * cout].reshape(n, h2o, w2o, cout), (0, 3, 1, 2))
    pool_x = jnp.transpose(
        pool[:, :, :wp * cout].reshape(n, hp, wp, cout), (0, 3, 1, 2))
    return pool_x, x_full


# -------------------------- pure-JAX reference -------------------------------
def ref_forward(x, w1, b1, w2, b2):
    dn = ('NCHW', 'OIHW', 'NCHW')
    prec = lax.Precision.HIGHEST
    h = lax.conv_general_dilated(x, w1, (1, 1), 'VALID',
                                 dimension_numbers=dn, precision=prec)
    h = jnp.maximum(h + b1[None, :, None, None], 0.0)
    h = lax.conv_general_dilated(h, w2, (1, 1), 'VALID',
                                 dimension_numbers=dn, precision=prec)
    h = jnp.maximum(h + b2[None, :, None, None], 0.0)
    m = lax.reduce_window(h, jnp.float32(-jnp.inf), lax.max,
                          (1, 1, 2, 2), (1, 1, 1, 1), 'VALID')
    c = h.shape[1]
    f2d = jnp.asarray(np.outer(GAUSS_1D, GAUSS_1D))
    fw = jnp.tile(f2d[None, None], (c, 1, 1, 1))
    mp = jnp.pad(m, ((0, 0), (0, 0), (2, 2), (2, 2)))
    pool = lax.conv_general_dilated(mp, fw, (2, 2), 'VALID',
                                    dimension_numbers=dn,
                                    feature_group_count=c, precision=prec)
    return pool, h


if __name__ == "__main__":
    N, CIN, COUT, H, W = 2, 4, 8, 16, 16
    key = jax.random.PRNGKey(0)
    kx, k1, k2, k3, k4 = jax.random.split(key, 5)
    x = jax.random.normal(kx, (N, CIN, H, W), jnp.float32)
    # TODO(synk): e2cnn R2Conv expands an equivariant steerable-filter basis and
    # restricts bias to trivial-rep channels; here the (already expanded) conv
    # filters/bias are plain synthetic dense parameters.
    w1 = jax.random.normal(k1, (COUT, CIN, 3, 3), jnp.float32) / np.sqrt(9 * CIN)
    b1 = 0.1 * jax.random.normal(k2, (COUT,), jnp.float32)
    w2 = jax.random.normal(k3, (COUT, COUT, 3, 3), jnp.float32) / np.sqrt(9 * COUT)
    b2 = 0.1 * jax.random.normal(k4, (COUT,), jnp.float32)

    fwd = jax.jit(downconv_forward)
    pool_x, x_full = fwd(x, w1, b1, w2, b2)
    jax.block_until_ready((pool_x, x_full))

    assert x_full.shape == (N, COUT, H - 4, W - 4), x_full.shape
    assert pool_x.shape == (N, COUT, H // 2 - 2, W // 2 - 2), pool_x.shape

    pool_ref, x_full_ref = ref_forward(x, w1, b1, w2, b2)
    np.testing.assert_allclose(np.asarray(x_full), np.asarray(x_full_ref),
                               atol=5e-2, rtol=5e-2)
    np.testing.assert_allclose(np.asarray(pool_x), np.asarray(pool_ref),
                               atol=5e-2, rtol=5e-2)
    print("KERNEL_OK")
</pallas_src>

<mosaic_0001>
module attributes {stable_mosaic.version = 11 : i64} {
  func.func @_downconv_kernel(%arg0: i32, %arg1: memref<32x64xbf16, #tpu.memory_space<vmem>>, %arg2: memref<192x128xbf16, #tpu.memory_space<vmem>>, %arg3: memref<1x128xf32, #tpu.memory_space<vmem>>, %arg4: memref<384x128xbf16, #tpu.memory_space<vmem>>, %arg5: memref<1x128xf32, #tpu.memory_space<vmem>>, %arg6: memref<12x27xbf16, #tpu.memory_space<vmem>>, %arg7: memref<88x128xbf16, #tpu.memory_space<vmem>>, %arg8: memref<2x12x128xf32, #tpu.memory_space<vmem>>, %arg9: memref<2x6x128xf32, #tpu.memory_space<vmem>>) attributes {dimension_semantics = [#tpu.dimension_semantics<parallel>], iteration_bounds = array<i64: 1>, scalar_prefetch = 0 : i64, scratch_operands = 0 : i64, tpu.core_type = #tpu.core_type<tc>, window_params = [{transform_indices = @transform_0, window_bounds = array<i64: 32, 64>}, {pipeline_mode = #tpu.pipeline_mode<synchronous>, transform_indices = @transform_1, window_bounds = array<i64: 192, 128>}, {pipeline_mode = #tpu.pipeline_mode<synchronous>, transform_indices = @transform_2, window_bounds = array<i64: 1, 128>}, {pipeline_mode = #tpu.pipeline_mode<synchronous>, transform_indices = @transform_3, window_bounds = array<i64: 384, 128>}, {pipeline_mode = #tpu.pipeline_mode<synchronous>, transform_indices = @transform_4, window_bounds = array<i64: 1, 128>}, {pipeline_mode = #tpu.pipeline_mode<synchronous>, transform_indices = @transform_5, window_bounds = array<i64: 12, 27>}, {pipeline_mode = #tpu.pipeline_mode<synchronous>, transform_indices = @transform_6, window_bounds = array<i64: 88, 128>}, {transform_indices = @transform_7, window_bounds = array<i64: 2, 12, 128>}, {transform_indices = @transform_8, window_bounds = array<i64: 2, 6, 128>}]} {
    %c0 = arith.constant 0 : index
    %c0_0 = arith.constant 0 : index
    %0 = vector.load %arg1[%c0, %c0_0] : memref<32x64xbf16, #tpu.memory_space<vmem>>, vector<32x64xbf16>
    %1 = vector.extract_strided_slice %0 {offsets = [0, 0], sizes = [30, 64], strides = [1, 1]} : vector<32x64xbf16> to vector<30x64xbf16>
    %2 = vector.extract_strided_slice %0 {offsets = [1, 0], sizes = [30, 64], strides = [1, 1]} : vector<32x64xbf16> to vector<30x64xbf16>
    %3 = vector.extract_strided_slice %0 {offsets = [2, 0], sizes = [30, 64], strides = [1, 1]} : vector<32x64xbf16> to vector<30x64xbf16>
    %4 = tpu.concatenate %1, %2, %3 in 1 : vector<30x64xbf16>, vector<30x64xbf16>, vector<30x64xbf16> -> vector<30x192xbf16>
    %c0_1 = arith.constant 0 : index
    %c0_2 = arith.constant 0 : index
    %5 = vector.load %arg2[%c0_1, %c0_2] : memref<192x128xbf16, #tpu.memory_space<vmem>>, vector<192x128xbf16>
    %cst = arith.constant dense<0.000000e+00> : vector<30x128xf32>
    %6 = tpu.matmul %4, %5, %cst {dimension_numbers = #tpu.dot_dimension_numbers<[1], [0], [0], [1], [0, 0, 1, 1], [], []>} : vector<30x192xbf16>, vector<192x128xbf16>, vector<30x128xf32> -> vector<30x128xf32>
    %c0_3 = arith.constant 0 : index
    %c0_4 = arith.constant 0 : index
    %7 = vector.load %arg3[%c0_3, %c0_4] : memref<1x128xf32, #tpu.memory_space<vmem>>, vector<1x128xf32>
    %8 = vector.broadcast %7 : vector<1x128xf32> to vector<30x128xf32>
    %9 = arith.addf %6, %8 : vector<30x128xf32>
    %cst_5 = arith.constant 0.000000e+00 : f32
    %10 = vector.broadcast %cst_5 : f32 to vector<30x128xf32>
    %11 = arith.maximumf %9, %10 : vector<30x128xf32>
    %12 = arith.truncf %11 : vector<30x128xf32> to vector<30x128xbf16>
    %13 = vector.extract_strided_slice %12 {offsets = [0, 0], sizes = [28, 128], strides = [1, 1]} : vector<30x128xbf16> to vector<28x128xbf16>
    %14 = vector.extract_strided_slice %12 {offsets = [1, 0], sizes = [28, 128], strides = [1, 1]} : vector<30x128xbf16> to vector<28x128xbf16>
    %15 = vector.extract_strided_slice %12 {offsets = [2, 0], sizes = [28, 128], strides = [1, 1]} : vector<30x128xbf16> to vector<28x128xbf16>
    %16 = tpu.concatenate %13, %14, %15 in 1 : vector<28x128xbf16>, vector<28x128xbf16>, vector<28x128xbf16> -> vector<28x384xbf16>
    %c0_6 = arith.constant 0 : index
    %c0_7 = arith.constant 0 : index
    %17 = vector.load %arg4[%c0_6, %c0_7] : memref<384x128xbf16, #tpu.memory_space<vmem>>, vector<384x128xbf16>
    %cst_8 = arith.constant dense<0.000000e+00> : vector<28x128xf32>
    %18 = tpu.matmul %16, %17, %cst_8 {dimension_numbers = #tpu.dot_dimension_numbers<[1], [0], [0], [1], [0, 0, 1, 1], [], []>} : vector<28x384xbf16>, vector<384x128xbf16>, vector<28x128xf32> -> vector<28x128xf32>
    %c0_9 = arith.constant 0 : index
    %c0_10 = arith.constant 0 : index
    %19 = vector.load %arg5[%c0_9, %c0_10] : memref<1x128xf32, #tpu.memory_space<vmem>>, vector<1x128xf32>
    %20 = vector.broadcast %19 : vector<1x128xf32> to vector<28x128xf32>
    %21 = arith.addf %18, %20 : vector<28x128xf32>
    %cst_11 = arith.constant 0.000000e+00 : f32
    %22 = vector.broadcast %cst_11 : f32 to vector<28x128xf32>
    %23 = arith.maximumf %21, %22 : vector<28x128xf32>
    %24 = vector.extract_strided_slice %23 {offsets = [0, 0], sizes = [12, 128], strides = [1, 1]} : vector<28x128xf32> to vector<12x128xf32>
    %c0_12 = arith.constant 0 : index
    %c0_13 = arith.constant 0 : index
    %c0_14 = arith.constant 0 : index
    %25 = vector.load %arg8[%c0_12, %c0_13, %c0_14] : memref<2x12x128xf32, #tpu.memory_space<vmem>>, vector<1x12x128xf32>
    %26 = vector.shape_cast %25 : vector<1x12x128xf32> to vector<12x128xf32>
    %27 = vector.shape_cast %24 : vector<12x128xf32> to vector<1x12x128xf32>
    tpu.vector_store %arg8[%c0_12, %c0_13, %c0_14], %27 {strides = array<i32>} : memref<2x12x128xf32, #tpu.memory_space<vmem>>, vector<1x12x128xf32>,
    %28 = vector.extract_strided_slice %23 {offsets = [16, 0], sizes = [12, 128], strides = [1, 1]} : vector<28x128xf32> to vector<12x128xf32>
    %c1 = arith.constant 1 : index
    %c0_15 = arith.constant 0 : index
    %c0_16 = arith.constant 0 : index
    %29 = vector.load %arg8[%c1, %c0_15, %c0_16] : memref<2x12x128xf32, #tpu.memory_space<vmem>>, vector<1x12x128xf32>
    %30 = vector.shape_cast %29 : vector<1x12x128xf32> to vector<12x128xf32>
    %31 = vector.shape_cast %28 : vector<12x128xf32> to vector<1x12x128xf32>
    tpu.vector_store %arg8[%c1, %c0_15, %c0_16], %31 {strides = array<i32>} : memref<2x12x128xf32, #tpu.memory_space<vmem>>, vector<1x12x128xf32>,
    %32 = vector.extract_strided_slice %23 {offsets = [0, 0], sizes = [28, 88], strides = [1, 1]} : vector<28x128xf32> to vector<28x88xf32>
    %33 = vector.extract_strided_slice %23 {offsets = [0, 8], sizes = [28, 88], strides = [1, 1]} : vector<28x128xf32> to vector<28x88xf32>
    %34 = arith.maximumf %32, %33 : vector<28x88xf32>
    %35 = vector.extract_strided_slice %34 {offsets = [0, 0], sizes = [27, 88], strides = [1, 1]} : vector<28x88xf32> to vector<27x88xf32>
    %36 = vector.extract_strided_slice %34 {offsets = [1, 0], sizes = [27, 88], strides = [1, 1]} : vector<28x88xf32> to vector<27x88xf32>
    %37 = arith.maximumf %35, %36 : vector<27x88xf32>
    %38 = arith.truncf %37 : vector<27x88xf32> to vector<27x88xbf16>
    %c0_17 = arith.constant 0 : index
    %c0_18 = arith.constant 0 : index
    %39 = vector.load %arg6[%c0_17, %c0_18] : memref<12x27xbf16, #tpu.memory_space<vmem>>, vector<12x27xbf16>
    %cst_19 = arith.constant dense<0.000000e+00> : vector<12x88xf32>
    %40 = tpu.matmul %39, %38, %cst_19 {dimension_numbers = #tpu.dot_dimension_numbers<[1], [0], [0], [1], [0, 0, 1, 1], [], []>} : vector<12x27xbf16>, vector<27x88xbf16>, vector<12x88xf32> -> vector<12x88xf32>
    %41 = arith.truncf %40 : vector<12x88xf32> to vector<12x88xbf16>
    %c0_20 = arith.constant 0 : index
    %c0_21 = arith.constant 0 : index
    %42 = vector.load %arg7[%c0_20, %c0_21] : memref<88x128xbf16, #tpu.memory_space<vmem>>, vector<88x128xbf16>
    %cst_22 = arith.constant dense<0.000000e+00> : vector<12x128xf32>
    %43 = tpu.matmul %41, %42, %cst_22 {dimension_numbers = #tpu.dot_dimension_numbers<[1], [0], [0], [1], [0, 0, 1, 1], [], []>} : vector<12x88xbf16>, vector<88x128xbf16>, vector<12x128xf32> -> vector<12x128xf32>
    %44 = vector.extract_strided_slice %43 {offsets = [0, 0], sizes = [6, 128], strides = [1, 1]} : vector<12x128xf32> to vector<6x128xf32>
    %c0_23 = arith.constant 0 : index
    %c0_24 = arith.constant 0 : index
    %c0_25 = arith.constant 0 : index
    %45 = vector.load %arg9[%c0_23, %c0_24, %c0_25] : memref<2x6x128xf32, #tpu.memory_space<vmem>>, vector<1x6x128xf32>
    %46 = vector.shape_cast %45 : vector<1x6x128xf32> to vector<6x128xf32>
    %47 = vector.shape_cast %44 : vector<6x128xf32> to vector<1x6x128xf32>
    tpu.vector_store %arg9[%c0_23, %c0_24, %c0_25], %47 {strides = array<i32>} : memref<2x6x128xf32, #tpu.memory_space<vmem>>, vector<1x6x128xf32>,
    %48 = vector.extract_strided_slice %43 {offsets = [6, 0], sizes = [6, 128], strides = [1, 1]} : vector<12x128xf32> to vector<6x128xf32>
    %c1_26 = arith.constant 1 : index
    %c0_27 = arith.constant 0 : index
    %c0_28 = arith.constant 0 : index
    %49 = vector.load %arg9[%c1_26, %c0_27, %c0_28] : memref<2x6x128xf32, #tpu.memory_space<vmem>>, vector<1x6x128xf32>
    %50 = vector.shape_cast %49 : vector<1x6x128xf32> to vector<6x128xf32>
    %51 = vector.shape_cast %48 : vector<6x128xf32> to vector<1x6x128xf32>
    tpu.vector_store %arg9[%c1_26, %c0_27, %c0_28], %51 {strides = array<i32>} : memref<2x6x128xf32, #tpu.memory_space<vmem>>, vector<1x6x128xf32>,
    return
  }
  func.func @transform_0(%arg0: i32) -> (i32, i32) {
    %c0_i32 = arith.constant 0 : i32
    %c0_i32_0 = arith.constant 0 : i32
    return %arg0, %c0_i32 : i32, i32
  }
  func.func @transform_1(%arg0: i32) -> (i32, i32) {
    %c0_i32 = arith.constant 0 : i32
    %c0_i32_0 = arith.constant 0 : i32
    %c0_i32_1 = arith.constant 0 : i32
    return %c0_i32, %c0_i32_0 : i32, i32
  }
  func.func @transform_2(%arg0: i32) -> (i32, i32) {
    %c0_i32 = arith.constant 0 : i32
    %c0_i32_0 = arith.constant 0 : i32
    %c0_i32_1 = arith.constant 0 : i32
    return %c0_i32, %c0_i32_0 : i32, i32
  }
  func.func @transform_3(%arg0: i32) -> (i32, i32) {
    %c0_i32 = arith.constant 0 : i32
    %c0_i32_0 = arith.constant 0 : i32
    %c0_i32_1 = arith.constant 0 : i32
    return %c0_i32, %c0_i32_0 : i32, i32
  }
  func.func @transform_4(%arg0: i32) -> (i32, i32) {
    %c0_i32 = arith.constant 0 : i32
    %c0_i32_0 = arith.constant 0 : i32
    %c0_i32_1 = arith.constant 0 : i32
    return %c0_i32, %c0_i32_0 : i32, i32
  }
  func.func @transform_5(%arg0: i32) -> (i32, i32) {
    %c0_i32 = arith.constant 0 : i32
    %c0_i32_0 = arith.constant 0 : i32
    %c0_i32_1 = arith.constant 0 : i32
    return %c0_i32, %c0_i32_0 : i32, i32
  }
  func.func @transform_6(%arg0: i32) -> (i32, i32) {
    %c0_i32 = arith.constant 0 : i32
    %c0_i32_0 = arith.constant 0 : i32
    %c0_i32_1 = arith.constant 0 : i32
    return %c0_i32, %c0_i32_0 : i32, i32
  }
  func.func @transform_7(%arg0: i32) -> (i32, i32, i32) {
    %c0_i32 = arith.constant 0 : i32
    %c0_i32_0 = arith.constant 0 : i32
    %c0_i32_1 = arith.constant 0 : i32
    return %arg0, %c0_i32, %c0_i32_0 : i32, i32, i32
  }
  func.func @transform_8(%arg0: i32) -> (i32, i32, i32) {
    %c0_i32 = arith.constant 0 : i32
    %c0_i32_0 = arith.constant 0 : i32
    %c0_i32_1 = arith.constant 0 : i32
    return %arg0, %c0_i32, %c0_i32_0 : i32, i32, i32
  }
}

</mosaic_0001>

<bundles_post_ra>
// kernel: tile.13
= control target key start
LH: loop header
LB: loop body
LE: loop exit
PB: predicated region body
PF: predicated region fallthrough
CT: control target
= control target key end

     0   :  { %s28_s0 = inlined_call_operand.vmem [shape: f32[8], index: 0, kind: input, shape index: {}]   ;;  %s29_s1 = inlined_call_operand.vmem [shape: f32[14,8], index: 1, kind: output, shape index: {}]  }
   0x1   :  { %v4_v0 = vld [vmem:[%s28_s0] ss:$0 sm:$0xff] }
   0x2   :  { %5 = vst [vmem:[%s29_s1] sm:$0xff] %v4_v0  ;;  %8 = vst [vmem:[%s29_s1 + $0x8] sm:$0xff] %v4_v0 }

// kernel: tile.18
= control target key start
LH: loop header
LB: loop body
LE: loop exit
PB: predicated region body
PF: predicated region fallthrough
CT: control target
= control target key end

     0   :  { %s28_s0 = inlined_call_operand.vmem [shape: f32[8], index: 0, kind: input, shape index: {}]   ;;  %s29_s1 = inlined_call_operand.vmem [shape: f32[12,8], index: 1, kind: output, shape index: {}]  }
   0x1   :  { %v4_v0 = vld [vmem:[%s28_s0] ss:$0 sm:$0xff] }
   0x2   :  { %5 = vst [vmem:[%s29_s1] sm:$0xff] %v4_v0  ;;  %8 = vst [vmem:[%s29_s1 + $0x8] sm:$0xff] %v4_v0 }

// kernel: tile.14
= control target key start
LH: loop header
LB: loop body
LE: loop exit
PB: predicated region body
PF: predicated region fallthrough
CT: control target
= control target key end

     0   :  { %s115_s10 = smov 104   ;;  %s116_s11 = smov 88   ;;  %vm3_vm0 = vcmask 64512   ;;  %vm9_vm1 = vcmask 917312   ;;  %vm15_vm2 = vcmask 851712   ;;  %vm21_vm3 = vcmask 786112   ;;  %s183_s0 = inlined_call_operand.vmem [shape: f32[14,8], index: 0, kind: input, shape index: {}]   ;;  %s184_s1 = inlined_call_operand.vmem [shape: f32[112], index: 1, kind: output, shape index: {}]  }
   0x1   :  { %v89_v0 = vld [vmem:[%s183_s0 + $0xd] sm:$0x1]   ;;  %v91_v1 = vld [vmem:[%s183_s0 + $0xb] sm:$0x1]   ;;  %v90_v2 = vld [vmem:[%s183_s0 + $0xc] sm:$0x1]  }
   0x2   :  { %7 = vrot.lane.b32.xlu0 %v89_v0, %s115_s10  ;;  %19 = vrot.lane.b32.xlu1 %v91_v1, %s116_s11  ;;  %v92_v3 = vld [vmem:[%s183_s0 + $0xa] sm:$0x1]   ;;  %s117_s16 = smov 96   ;;  %s118_s17 = smov 80   ;;  %v93_v4 = vld [vmem:[%s183_s0 + $0x9] sm:$0x1]  }
   0x3   :  { %v94_v5 = vld [vmem:[%s183_s0 + $0x8] sm:$0x1]   ;;  %v2_v6 = vld [vmem:[%s183_s0] sm:$0x1]   ;;  %s119_s24 = smov 72   ;;  %s120_s25 = smov 64  }
   0x4   :  { %4 = vst.msk [vmem:[#allocation0] sm:$0x1] %vm3_vm0, %v2_v6   ;;  %v95_v7 = vld [vmem:[%s183_s0 + $0x7] sm:$0x1]   ;;  %v96_v8 = vld [vmem:[%s183_s0 + $0x6] sm:$0x1]  }
   0x5   :  { %s121_s30 = smov 56   ;;  %s122_s2 = smov 48   ;;  %v97_v9 = vld [vmem:[%s183_s0 + $0x5] sm:$0x1]   ;;  %v98_v10 = vld [vmem:[%s183_s0 + $0x4] sm:$0x1]  }
   0x6   :  { %13 = vrot.lane.b32.xlu0 %v90_v2, %s117_s16  ;;  %25 = vrot.lane.b32.xlu1 %v92_v3, %s118_s17  ;;  %s123_s7 = smov 40   ;;  %s124_s8 = smov 32   ;;  %v99_v11 = vld [vmem:[%s183_s0 + $0x3] sm:$0x1]   ;;  %v100_v12 = vld [vmem:[%s183_s0 + $0x2] sm:$0x1]  }
   0x7   :  { %s125_s13 = smov 24   ;;  %s126_s14 = smov 16   ;;  %v101_v13 = vld [vmem:[%s183_s0 + $0x1] sm:$0x1]   ;;  %vm27_vm4 = vcmask 720512   ;;  %vm33_vm5 = vcmask 654912  }
   0x8   :  { %s127_s0 = smov 8   ;;  %vm39_vm6 = vcmask 589312   ;;  %vm45_vm7 = vcmask 523712   ;;  %vm51_vm8 = vcmask 458112   ;;  %vm57_vm9 = vcmask 392512  }
   0x9   :  { %vm63_vm10 = vcmask 326912   ;;  %vm69_vm11 = vcmask 261312   ;;  %vm75_vm12 = vcmask 195712   ;;  %vm81_vm13 = vcmask 130112  }
   0xa   :  { %31 = vrot.lane.b32.xlu0 %v93_v4, %s119_s24  ;;  %37 = vrot.lane.b32.xlu1 %v94_v5, %s120_s25 }
   0xe   :  { %43 = vrot.lane.b32.xlu0 %v95_v7, %s121_s30  ;;  %49 = vrot.lane.b32.xlu1 %v96_v8, %s122_s2 }
  0x12   :  { %55 = vrot.lane.b32.xlu0 %v97_v9, %s123_s7  ;;  %61 = vrot.lane.b32.xlu1 %v98_v10, %s124_s8 }
  0x16   :  { %67 = vrot.lane.b32.xlu0 %v99_v11, %s125_s13  ;;  %73 = vrot.lane.b32.xlu1 %v100_v12, %s126_s14 }
  0x1a   :  { %79 = vrot.lane.b32.xlu0 %v101_v13, %s127_s0 }
  0x74   :  { %v8_v14 = vpop.permute.xlu0 %7   ;;  %v20_v15 = vpop.permute.xlu1 %19  }
  0x75   :  { %10 = vst.msk [vmem:[#allocation0] sm:$0x1] %vm9_vm1, %v8_v14  }
  0x78   :  { %v14_v16 = vpop.permute.xlu0 %13   ;;  %v26_v17 = vpop.permute.xlu1 %25  }
  0x79   :  { %16 = vst.msk [vmem:[#allocation0] sm:$0x1] %vm15_vm2, %v14_v16  }
  0x7a   :  { %22 = vst.msk [vmem:[#allocation0] sm:$0x1] %vm21_vm3, %v20_v15  }
  0x7b   :  { %28 = vst.msk [vmem:[#allocation0] sm:$0x1] %vm27_vm4, %v26_v17  }
  0x7c   :  { %v32_v18 = vpop.permute.xlu0 %31   ;;  %v38_v19 = vpop.permute.xlu1 %37  }
  0x7d   :  { %34 = vst.msk [vmem:[#allocation0] sm:$0x1] %vm33_vm5, %v32_v18  }
  0x7e   :  { %40 = vst.msk [vmem:[#allocation0] sm:$0x1] %vm39_vm6, %v38_v19  }
  0x80   :  { %v44_v20 = vpop.permute.xlu0 %43   ;;  %v50_v21 = vpop.permute.xlu1 %49  }
  0x81   :  { %46 = vst.msk [vmem:[#allocation0] sm:$0x1] %vm45_vm7, %v44_v20  }
  0x82   :  { %52 = vst.msk [vmem:[#allocation0] sm:$0x1] %vm51_vm8, %v50_v21  }
  0x84   :  { %v56_v22 = vpop.permute.xlu0 %55   ;;  %v62_v23 = vpop.permute.xlu1 %61  }
  0x85   :  { %58 = vst.msk [vmem:[#allocation0] sm:$0x1] %vm57_vm9, %v56_v22  }
  0x86   :  { %64 = vst.msk [vmem:[#allocation0] sm:$0x1] %vm63_vm10, %v62_v23  }
  0x88   :  { %v68_v24 = vpop.permute.xlu0 %67   ;;  %v74_v25 = vpop.permute.xlu1 %73  }
  0x89   :  { %70 = vst.msk [vmem:[#allocation0] sm:$0x1] %vm69_vm11, %v68_v24  }
  0x8a   :  { %76 = vst.msk [vmem:[#allocation0] sm:$0x1] %vm75_vm12, %v74_v25  }
  0x8c   :  { %v80_v26 = vpop.permute.xlu0 %79  }
  0x8d   :  { %82 = vst.msk [vmem:[#allocation0] sm:$0x1] %vm81_vm13, %v80_v26  }
  0x94   :  { %v86_v27 = vld [vmem:[#allocation0] sm:$0x1] }
  0x95   :  { %88 = vst [vmem:[%s184_s1] sm:$0x1] %v86_v27 }

// kernel: tile.19
= control target key start
LH: loop header
LB: loop body
LE: loop exit
PB: predicated region body
PF: predicated region fallthrough
CT: control target
= control target key end

     0   :  { %s99_s10 = smov 88   ;;  %s100_s11 = smov 72   ;;  %vm3_vm0 = vcmask 64512   ;;  %vm9_vm1 = vcmask 786112   ;;  %vm15_vm2 = vcmask 720512   ;;  %vm21_vm3 = vcmask 654912   ;;  %s159_s0 = inlined_call_operand.vmem [shape: f32[12,8], index: 0, kind: input, shape index: {}]   ;;  %s160_s1 = inlined_call_operand.vmem [shape: f32[96], index: 1, kind: output, shape index: {}]  }
   0x1   :  { %v77_v0 = vld [vmem:[%s159_s0 + $0xb] sm:$0x1]   ;;  %v79_v1 = vld [vmem:[%s159_s0 + $0x9] sm:$0x1]   ;;  %v78_v2 = vld [vmem:[%s159_s0 + $0xa] sm:$0x1]  }
   0x2   :  { %7 = vrot.lane.b32.xlu0 %v77_v0, %s99_s10  ;;  %19 = vrot.lane.b32.xlu1 %v79_v1, %s100_s11  ;;  %v80_v3 = vld [vmem:[%s159_s0 + $0x8] sm:$0x1]   ;;  %s101_s16 = smov 80   ;;  %s102_s17 = smov 64   ;;  %v81_v4 = vld [vmem:[%s159_s0 + $0x7] sm:$0x1]  }
   0x3   :  { %v2_v5 = vld [vmem:[%s159_s0] sm:$0x1]   ;;  %v82_v6 = vld [vmem:[%s159_s0 + $0x6] sm:$0x1]   ;;  %s103_s24 = smov 56   ;;  %s104_s25 = smov 48  }
   0x4   :  { %4 = vst.msk [vmem:[#allocation0] sm:$0x1] %vm3_vm0, %v2_v5   ;;  %v83_v7 = vld [vmem:[%s159_s0 + $0x5] sm:$0x1]   ;;  %v84_v8 = vld [vmem:[%s159_s0 + $0x4] sm:$0x1]  }
   0x5   :  { %s105_s30 = smov 40   ;;  %s106_s2 = smov 32   ;;  %v85_v9 = vld [vmem:[%s159_s0 + $0x3] sm:$0x1]   ;;  %v86_v10 = vld [vmem:[%s159_s0 + $0x2] sm:$0x1]  }
   0x6   :  { %13 = vrot.lane.b32.xlu0 %v78_v2, %s101_s16  ;;  %25 = vrot.lane.b32.xlu1 %v80_v3, %s102_s17  ;;  %s107_s7 = smov 24   ;;  %s108_s8 = smov 16   ;;  %v87_v11 = vld [vmem:[%s159_s0 + $0x1] sm:$0x1]   ;;  %vm27_vm4 = vcmask 589312   ;;  %vm33_vm5 = vcmask 523712  }
   0x7   :  { %s109_s0 = smov 8   ;;  %vm39_vm6 = vcmask 458112   ;;  %vm45_vm7 = vcmask 392512   ;;  %vm51_vm8 = vcmask 326912   ;;  %vm57_vm9 = vcmask 261312  }
   0x8   :  { %vm63_vm10 = vcmask 195712   ;;  %vm69_vm11 = vcmask 130112  }
   0xa   :  { %31 = vrot.lane.b32.xlu0 %v81_v4, %s103_s24  ;;  %37 = vrot.lane.b32.xlu1 %v82_v6, %s104_s25 }
   0xe   :  { %43 = vrot.lane.b32.xlu0 %v83_v7, %s105_s30  ;;  %49 = vrot.lane.b32.xlu1 %v84_v8, %s106_s2 }
  0x12   :  { %55 = vrot.lane.b32.xlu0 %v85_v9, %s107_s7  ;;  %61 = vrot.lane.b32.xlu1 %v86_v10, %s108_s8 }
  0x16   :  { %67 = vrot.lane.b32.xlu0 %v87_v11, %s109_s0 }
  0x74   :  { %v8_v12 = vpop.permute.xlu0 %7   ;;  %v20_v13 = vpop.permute.xlu1 %19  }
  0x75   :  { %10 = vst.msk [vmem:[#allocation0] sm:$0x1] %vm9_vm1, %v8_v12  }
  0x78   :  { %v14_v14 = vpop.permute.xlu0 %13   ;;  %v26_v15 = vpop.permute.xlu1 %25  }
  0x79   :  { %16 = vst.msk [vmem:[#allocation0] sm:$0x1] %vm15_vm2, %v14_v14  }
  0x7a   :  { %22 = vst.msk [vmem:[#allocation0] sm:$0x1] %vm21_vm3, %v20_v13  }
  0x7b   :  { %28 = vst.msk [vmem:[#allocation0] sm:$0x1] %vm27_vm4, %v26_v15  }
  0x7c   :  { %v32_v16 = vpop.permute.xlu0 %31   ;;  %v38_v17 = vpop.permute.xlu1 %37  }
  0x7d   :  { %34 = vst.msk [vmem:[#allocation0] sm:$0x1] %vm33_vm5, %v32_v16  }
  0x7e   :  { %40 = vst.msk [vmem:[#allocation0] sm:$0x1] %vm39_vm6, %v38_v17  }
  0x80   :  { %v44_v18 = vpop.permute.xlu0 %43   ;;  %v50_v19 = vpop.permute.xlu1 %49  }
  0x81   :  { %46 = vst.msk [vmem:[#allocation0] sm:$0x1] %vm45_vm7, %v44_v18  }
  0x82   :  { %52 = vst.msk [vmem:[#allocation0] sm:$0x1] %vm51_vm8, %v50_v19  }
  0x84   :  { %v56_v20 = vpop.permute.xlu0 %55   ;;  %v62_v21 = vpop.permute.xlu1 %61  }
  0x85   :  { %58 = vst.msk [vmem:[#allocation0] sm:$0x1] %vm57_vm9, %v56_v20  }
  0x86   :  { %64 = vst.msk [vmem:[#allocation0] sm:$0x1] %vm63_vm10, %v62_v21  }
  0x88   :  { %v68_v22 = vpop.permute.xlu0 %67  }
  0x89   :  { %70 = vst.msk [vmem:[#allocation0] sm:$0x1] %vm69_vm11, %v68_v22  }
  0x90   :  { %v74_v23 = vld [vmem:[#allocation0] sm:$0x1] }
  0x91   :  { %76 = vst [vmem:[%s160_s1] sm:$0x1] %v74_v23 }

// kernel: downconv_forward.1
= control target key start
LH: loop header
LB: loop body
LE: loop exit
PB: predicated region body
PF: predicated region fallthrough
CT: control target
= control target key end

     0   :  { %v978_v0 = vmov 0   ;;  %vm43_vm0 = vsmask.f32 7424  ;;  %vm63_vm1 = vcmask 1046528   ;;  %vm67_vm2 = vcmask 523264   ;;  %s979_s14 = smov 64   ;;  %s1226_s0 = inlined_call_operand.vmem [shape: bf16[32,64], index: 0, kind: input, shape index: {}]   ;;  %s1227_s1 = inlined_call_operand.vmem [shape: bf16[192,128], index: 1, kind: input, shape index: {}]   ;;  %s1228_s3 = inlined_call_operand.vmem [shape: bf16[384,128], index: 3, kind: input, shape index: {}]   ;;  %s1229_s2 = inlined_call_operand.vmem [shape: f32[1,128], index: 2, kind: input, shape index: {}]   ;;  %s1230_s4 = inlined_call_operand.vmem [shape: f32[1,128], index: 4, kind: input, shape index: {}]   ;;  %s1231_s7 = inlined_call_operand.vmem [shape: f32[2,12,128], index: 7, kind: output, shape index: {0}]   ;;  %s1232_s5 = inlined_call_operand.vmem [shape: bf16[12,27], index: 5, kind: input, shape index: {}]   ;;  %s1233_s6 = inlined_call_operand.vmem [shape: bf16[88,128], index: 6, kind: input, shape index: {}]   ;;  %s1234_s8 = inlined_call_operand.vmem [shape: f32[2,6,128], index: 8, kind: output, shape index: {1}]  }
   0x1   :  { %183 = vmatprep.subr.bf16.mxu0 %v978_v0  ;;  %v1033_v1 = vld [vmem:[%s1226_s0] sm:$0xff]   ;;  %v1038_v2 = vld [vmem:[%s1226_s0 + $0x8] sm:$0xff]   ;;  %v937_v14 = vld [vmem:[%s1227_s1 + $0x10] sm:$0xff]   ;;  %s980_s17 = smov 120   ;;  %vm982_vm3 = vmmov 0   ;;  %vm621_vm4 = vcmask 1044480  }
   0x2   :  { %v935_v3 = vld [vmem:[%s1227_s1] sm:$0xff]   ;;  %v45_v4 = vshrl.u32 %v1033_v1, 16  ;;  %v47_v5 = vshll.u32 %v1033_v1, 16  ;;  %v52_v6 = vshll.u32 %v1038_v2, 16  ;;  %v936_v7 = vld [vmem:[%s1227_s1 + $0x8] sm:$0xff]   ;;  %v56_v10 = vshrl.u32 %v1038_v2, 16 }
   0x3   :  { %184 = vmatpush1.bf16.msra.mxu0 %v935_v3  ;;  %v64_v11 = vrot.slane %v1033_v1, 1  ;;  %v65_v13 = vrot.slane %v1038_v2, 1  ;;  %v938_v18 = vld [vmem:[%s1227_s1 + $0x18] sm:$0xff]   ;;  %v939_v19 = vld [vmem:[%s1227_s1 + $0x20] sm:$0xff]   ;;  %v949_v22 = vld [vmem:[%s1228_s3 + $0x48] sm:$0xff]   ;;  %vm622_vm5 = vcmask 1045504  }
   0x4   :  { %v49_v8 = vrot.slane %v47_v5, 1  ;;  %v54_v9 = vrot.slane %v52_v6, 1  ;;  %185 = vmatprep.subr.bf16.mxu0 %v978_v0  ;;  %v947_v20 = vld [vmem:[%s1228_s3 + $0x40] sm:$0xff]   ;;  %v950_v23 = vld [vmem:[%s1228_s3 + $0x8] sm:$0xff]   ;;  %v951_v24 = vld [vmem:[%s1228_s3 + $0x50] sm:$0xff]   ;;  %vm617_vm6 = vcmask 220160  }
   0x5   :  { %v66_v16 = vsel %vm63_vm1, %v64_v11, %v65_v13  ;;  %v948_v21 = vld [vmem:[%s1228_s3] sm:$0xff]   ;;  %830 = vmatprep.subr.bf16.mxu1 %v947_v20  ;;  %v940_v25 = vld [vmem:[%s1227_s1 + $0x28] sm:$0xff]   ;;  %v952_v26 = vld [vmem:[%s1228_s3 + $0x10] sm:$0xff]   ;;  %vm718_vm7 = vcmask 1043456   ;;  %vm714_vm8 = vcmask 719872  }
   0x6   :  { %v50_v12 = vor.u32 %v49_v8, %v45_v4  ;;  %v58_v17 = vor.u32 %v56_v10, %v54_v9  ;;  %790 = vmatprep.mubr.msk.bf16.mxu0 %vm67_vm2, %v66_v16  ;;  %831 = vmatpush3.bf16.msra.mxu1 %v948_v21  ;;  %v941_v27 = vld [vmem:[%s1227_s1 + $0x30] sm:$0xff]   ;;  %v942_v28 = vld [vmem:[%s1227_s1 + $0x38] sm:$0xff]   ;;  %v943_v29 = vld [vmem:[%s1227_s1 + $0x40] sm:$0xff]  }
   0x7   :  { %186 = vmatpush1.bf16.msra.mxu0 %v936_v7  ;;  %832 = vmatprep.subr.bf16.mxu1 %v949_v22  ;;  %v944_v30 = vld [vmem:[%s1227_s1 + $0x48] sm:$0xff]   ;;  %v945_v31 = vld [vmem:[%s1227_s1 + $0x50] sm:$0xff]   ;;  %v946_v32 = vld [vmem:[%s1227_s1 + $0x58] sm:$0xff]  }
   0x8   :  { %v55_v15 = vsel %vm43_vm0, %v50_v12, %v54_v9  ;;  %187 = vmatprep.subr.bf16.mxu0 %v978_v0  ;;  %v953_v37 = vld [vmem:[%s1228_s3 + $0x58] sm:$0xff]   ;;  %v955_v39 = vld [vmem:[%s1228_s3 + $0x60] sm:$0xff]   ;;  %v957_v41 = vld [vmem:[%s1228_s3 + $0x68] sm:$0xff]  }
   0x9   :  { %59 = vrot.lane.b32.xlu0 %v55_v15, %s979_s14  ;;  %v954_v38 = vld [vmem:[%s1228_s3 + $0x18] sm:$0xff]   ;;  %v956_v40 = vld [vmem:[%s1228_s3 + $0x20] sm:$0xff]   ;;  %v958_v42 = vld [vmem:[%s1228_s3 + $0x28] sm:$0xff]  }
   0xa   :  { %833 = vmatpush3.bf16.msra.mxu1 %v950_v23  ;;  %v959_v43 = vld [vmem:[%s1228_s3 + $0x70] sm:$0xff]   ;;  %v961_v45 = vld [vmem:[%s1228_s3 + $0x78] sm:$0xff]   ;;  %v963_v47 = vld [vmem:[%s1228_s3 + $0x80] sm:$0xff]  }
   0xb   :  { %188 = vmatpush1.bf16.msra.mxu0 %v937_v14  ;;  %834 = vmatprep.subr.bf16.mxu1 %v951_v24  ;;  %v960_v44 = vld [vmem:[%s1228_s3 + $0x30] sm:$0xff]   ;;  %v962_v46 = vld [vmem:[%s1228_s3 + $0x38] sm:$0xff]   ;;  %v777_v48 = vld [vmem:[%s1229_s2] ss:$0 sm:$0xff] }
   0xc   :  { %189 = vmatprep.subr.bf16.mxu0 %v978_v0  ;;  %v964_v15 = vld [vmem:[%s1228_s3 + $0x88] sm:$0xff]   ;;  %v965_v16 = vld [vmem:[%s1228_s3 + $0x90] sm:$0xff]   ;;  %v970_v21 = vld [vmem:[%s1228_s3 + $0xb8] sm:$0xff]  }
   0xd   :  { %61 = vrot.lane.b32.xlu0 %v58_v17, %s979_s14  ;;  %v966_v17 = vld [vmem:[%s1228_s3 + $0x98] sm:$0xff]   ;;  %v969_v20 = vld [vmem:[%s1228_s3 + $0xb0] sm:$0xff]  }
   0xe   :  { %835 = vmatpush3.bf16.msra.mxu1 %v952_v26 }
   0xf   :  { %190 = vmatpush1.bf16.msra.mxu0 %v938_v18  ;;  %836 = vmatprep.subr.bf16.mxu1 %v953_v37  ;;  %v967_v18 = vld [vmem:[%s1228_s3 + $0xa0] sm:$0xff]  }
  0x10   :  { %191 = vmatprep.subr.bf16.mxu0 %v978_v0 }
  0x12   :  { %837 = vmatpush3.bf16.msra.mxu1 %v954_v38 }
  0x13   :  { %192 = vmatpush1.bf16.msra.mxu0 %v939_v19  ;;  %838 = vmatprep.subr.bf16.mxu1 %v955_v39  ;;  %v968_v19 = vld [vmem:[%s1228_s3 + $0xa8] sm:$0xff]  }
  0x14   :  { %193 = vmatprep.subr.bf16.mxu0 %v978_v0 }
  0x16   :  { %839 = vmatpush3.bf16.msra.mxu1 %v956_v40 }
  0x17   :  { %194 = vmatpush1.bf16.msra.mxu0 %v940_v25  ;;  %840 = vmatprep.subr.bf16.mxu1 %v957_v41 }
  0x18   :  { %195 = vmatprep.subr.bf16.mxu0 %v978_v0 }
  0x1a   :  { %841 = vmatpush3.bf16.msra.mxu1 %v958_v42 }
  0x1b   :  { %196 = vmatpush1.bf16.msra.mxu0 %v941_v27  ;;  %842 = vmatprep.subr.bf16.mxu1 %v959_v43 }
  0x1c   :  { %197 = vmatprep.subr.bf16.mxu0 %v978_v0 }
  0x1e   :  { %843 = vmatpush3.bf16.msra.mxu1 %v960_v44 }
  0x1f   :  { %198 = vmatpush1.bf16.msra.mxu0 %v942_v28  ;;  %844 = vmatprep.subr.bf16.mxu1 %v961_v45 }
  0x20   :  { %199 = vmatprep.subr.bf16.mxu0 %v978_v0 }
  0x22   :  { %845 = vmatpush3.bf16.msra.mxu1 %v962_v46 }
  0x23   :  { %200 = vmatpush1.bf16.msra.mxu0 %v943_v29  ;;  %878 = vmatprep.subr.bf16.mxu1 %v963_v47 }
  0x24   :  { %201 = vmatprep.subr.bf16.mxu0 %v978_v0 }
  0x27   :  { %202 = vmatpush1.bf16.msra.mxu0 %v944_v30 }
  0x28   :  { %203 = vmatprep.subr.bf16.mxu0 %v978_v0 }
  0x2b   :  { %204 = vmatpush1.bf16.msra.mxu0 %v945_v31 }
  0x2c   :  { %205 = vmatprep.subr.bf16.mxu0 %v978_v0 }
  0x2f   :  { %206 = vmatpush1.bf16.msra.mxu0 %v946_v32 }
  0x7b   :  { %v60_v33 = vpop.permute.xlu0 %59 }
  0x7c   :  { %v69_v34 = vsel %vm67_vm2, %v1033_v1, %v60_v33 }
  0x7d   :  { %216 = vmatmul.mubr.bf16.vlgmr.msra.gmra.mrb[0].mxu0 %v69_v34  ;;  %v792_v34 = vld [vmem:[%s1230_s4] ss:$0 sm:$0xff] }
  0x7e   :  { %791 = vmatprep.mubr.msk.bf16.mxu0 %vm67_vm2, %v65_v13 }
  0x7f   :  { %v62_v35 = vpop.permute.xlu0 %61 }
  0x80   :  { %v72_v36 = vsel %vm67_vm2, %v1038_v2, %v62_v35 }
  0x85   :  { %224 = vmatmul.mubr.bf16.gmra.mrb[4].mxu0 %v72_v36 }
 0x150   :  { %v217_v49 = vpop.f32.mrb[0].mxu0 }
 0x151   :  { %v218_v50 = vadd.f32 %v777_v48, %v217_v49  ;;  %v219_v51 = vpop.f32.mrb[1].mxu0 }
 0x152   :  { %v220_v52 = vpop.f32.mrb[2].mxu0 }
 0x153   :  { %v221_v53 = vadd.f32 %v777_v48, %v220_v52  ;;  %v222_v54 = vpop.f32.mrb[3].mxu0  ;;  %v232_v55 = vmax.f32 %v218_v50, 0.0  ;;  %v981_v52 = vmov 0.0  }
 0x154   :  { %906 = vmatprep.subr.bf16.mxu0 %v981_v52  ;;  %918 = vmatprep.mubr.msk.bf16.mxu0 %vm982_vm3, %v981_v52  ;;  %v973_v54 = vld [vmem:[%s1233_s6 + $0x8] sm:$0xff]  }
 0x155   :  { %v233_v56 = vmax.f32 %v221_v53, 0.0  ;;  %v972_v53 = vld [vmem:[%s1233_s6] sm:$0xff]  }
 0x156   :  { %907 = vmatpush3.bf16.msra.mxu0 %v972_v53 }
 0x157   :  { %v236_v57 = vpack.c.bf16 %v233_v56, %v232_v55  ;;  %908 = vmatprep.subr.bf16.mxu0 %v981_v52  ;;  %v974_v55 = vld [vmem:[%s1233_s6 + $0x10] sm:$0xff]   ;;  %v975_v56 = vld [vmem:[%s1233_s6 + $0x18] sm:$0xff]  }
 0x158   :  { %v225_v58 = vpop.f32.mrb[4].mxu0 }
 0x159   :  { %v226_v59 = vadd.f32 %v777_v48, %v225_v58  ;;  %v227_v60 = vpop.f32.mrb[5].mxu0  ;;  %v241_v0 = vshll.u32 %v236_v57, 16  ;;  %v239_v5 = vshrl.u32 %v236_v57, 16  ;;  %v257_v7 = vrot.slane %v236_v57, 1 }
 0x15a   :  { %v228_v61 = vpop.f32.mrb[6].mxu0  ;;  %909 = vmatpush3.bf16.msra.mxu0 %v973_v54 }
 0x15b   :  { %v229_v62 = vadd.f32 %v777_v48, %v228_v61  ;;  %v230_v63 = vpop.f32.mrb[7].mxu0  ;;  %v234_v1 = vmax.f32 %v226_v59, 0.0  ;;  %v243_v4 = vrot.slane %v241_v0, 1  ;;  %910 = vmatprep.subr.bf16.mxu0 %v981_v52 }
 0x15d   :  { %v235_v2 = vmax.f32 %v229_v62, 0.0  ;;  %v244_v9 = vor.u32 %v243_v4, %v239_v5 }
 0x15e   :  { %911 = vmatpush3.bf16.msra.mxu0 %v974_v55 }
 0x15f   :  { %v237_v3 = vpack.c.bf16 %v235_v2, %v234_v1  ;;  %912 = vmatprep.subr.bf16.mxu0 %v981_v52 }
 0x161   :  { %v246_v6 = vshll.u32 %v237_v3, 16  ;;  %v258_v8 = vrot.slane %v237_v3, 1  ;;  %v250_v11 = vshrl.u32 %v237_v3, 16 }
 0x162   :  { %913 = vmatpush3.bf16.msra.mxu0 %v975_v56 }
 0x163   :  { %v248_v10 = vrot.slane %v246_v6, 1  ;;  %v259_v12 = vsel %vm63_vm1, %v257_v7, %v258_v8  ;;  %914 = vmatprep.subr.bf16.mxu0 %v981_v52 }
 0x165   :  { %v249_v13 = vsel %vm43_vm0, %v244_v9, %v248_v10  ;;  %v252_v14 = vor.u32 %v250_v11, %v248_v10 }
 0x166   :  { %493 = vmatprep.mubr.bf16.mxu1 %v249_v13 }
 0x167   :  { %494 = vmatmul.mubr.bf16.vlgmr.msra.gmra.mrb[0].mxu1 %v236_v57  ;;  %v976_v57 = vld [vmem:[%s1233_s6 + $0x20] sm:$0xff]  }
 0x168   :  { %879 = vmatpush3.bf16.msra.mxu1 %v963_v47  ;;  %501 = vmatprep.mubr.bf16.mxu1 %v252_v14 }
 0x169   :  { %880 = vmatprep.subr.bf16.mxu1 %v964_v15  ;;  %915 = vmatpush3.bf16.msra.mxu0 %v976_v57 }
 0x16a   :  { %916 = vmatprep.subr.bf16.mxu0 %v981_v52 }
 0x16c   :  { %881 = vmatpush3.bf16.msra.mxu1 %v964_v15 }
 0x16d   :  { %882 = vmatprep.subr.bf16.mxu1 %v965_v16 }
 0x16f   :  { %502 = vmatmul.mubr.bf16.gmra.mrb[4].mxu1 %v237_v3 }
 0x170   :  { %883 = vmatpush3.bf16.msra.mxu1 %v965_v16  ;;  %894 = vmatprep.mubr.bf16.mxu1 %v259_v12 }
 0x171   :  { %884 = vmatprep.subr.bf16.mxu1 %v966_v17 }
 0x174   :  { %885 = vmatpush3.bf16.msra.mxu1 %v966_v17 }
 0x175   :  { %886 = vmatprep.subr.bf16.mxu1 %v967_v18 }
 0x178   :  { %887 = vmatpush3.bf16.msra.mxu1 %v967_v18 }
 0x179   :  { %888 = vmatprep.subr.bf16.mxu1 %v968_v19 }
 0x17c   :  { %889 = vmatpush3.bf16.msra.mxu1 %v968_v19 }
 0x17d   :  { %890 = vmatprep.subr.bf16.mxu1 %v969_v20 }
 0x180   :  { %891 = vmatpush3.bf16.msra.mxu1 %v969_v20  ;;  %v971_v20 = vld [vmem:[%s1232_s5] sm:$0x3f]  }
 0x181   :  { %892 = vmatprep.subr.bf16.mxu1 %v970_v21 }
 0x184   :  { %893 = vmatpush3.bf16.msra.mxu1 %v970_v21  ;;  %v977_v21 = vld [vmem:[%s1233_s6 + $0x28] ss:$0 sps:$4 sm:$0xff]  }
 0x185   :  { %898 = vmatprep.subr.bf16.mxu1 %v981_v52 }
 0x187   :  { %895 = vmatmul.mubr.bf16.vlgmr.msra.gmra.mrb[8].mxu1 %v258_v8  ;;  %v983_v8 = vmov 65535  }
 0x188   :  { %902 = vmatprep.mubr.msk.bf16.mxu1 %vm982_vm3, %v981_v52  ;;  %v623_v9 = vsel %vm621_vm4, 4294967295, %v983_v8 }
 0x189   :  { %v624_v18 = vsel %vm622_vm5, %v623_v9, 0 }
 0x23a   :  { %v846_v22 = vpop.f32.mrb[0].mxu1 }
 0x23b   :  { %v847_v23 = vpop.f32.mrb[1].mxu1 }
 0x23c   :  { %v848_v24 = vadd.f32 %v847_v23, %v846_v22  ;;  %v849_v25 = vpop.f32.mrb[2].mxu1  ;;  %v720_v22 = vsel %vm718_vm7, %v977_v21, 0 }
 0x23d   :  { %v850_v26 = vpop.f32.mrb[3].mxu1  ;;  %917 = vmatpush3.bf16.msra.mxu0 %v720_v22 }
 0x23e   :  { %v851_v27 = vadd.f32 %v850_v26, %v849_v25  ;;  %v496_v37 = vadd.f32 %v848_v24, %v792_v34 }
 0x240   :  { %v499_v43 = vadd.f32 %v851_v27, %v792_v34 }
 0x242   :  { %v852_v28 = vpop.f32.mrb[4].mxu1 }
 0x243   :  { %v853_v29 = vpop.f32.mrb[5].mxu1 }
 0x244   :  { %v854_v30 = vadd.f32 %v853_v29, %v852_v28  ;;  %v855_v31 = vpop.f32.mrb[6].mxu1 }
 0x245   :  { %v856_v32 = vpop.f32.mrb[7].mxu1 }
 0x246   :  { %v857_v33 = vadd.f32 %v856_v32, %v855_v31  ;;  %v504_v35 = vadd.f32 %v854_v30, %v792_v34 }
 0x248   :  { %v507_v40 = vadd.f32 %v857_v33, %v792_v34 }
 0x25a   :  { %v896_v36 = vpop.f32.mrb[8].mxu1 }
 0x25b   :  { %v553_v38 = vadd.f32 %v896_v36, %v504_v35  ;;  %v544_v39 = vpop.f32.mrb[9].mxu1 }
 0x25c   :  { %v545_v41 = vadd.f32 %v544_v39, %v496_v37  ;;  %v897_v42 = vpop.f32.mrb[10].mxu1 }
 0x25d   :  { %v561_v44 = vmax.f32 %v553_v38, 0.0  ;;  %v556_v45 = vadd.f32 %v897_v42, %v507_v40  ;;  %v547_v46 = vpop.f32.mrb[11].mxu1 }
 0x25e   :  { %v559_v47 = vmax.f32 %v545_v41, 0.0  ;;  %v548_v48 = vadd.f32 %v547_v46, %v499_v43 }
 0x25f   :  { %817 = vst [vmem:[%s1231_s7 + $0x10] sm:$0xff] %v561_v44  ;;  %v562_v49 = vmax.f32 %v556_v45, 0.0 }
 0x260   :  { %563 = vst [vmem:[%s1231_s7] sm:$0xff] %v559_v47  ;;  %v560_v50 = vmax.f32 %v548_v48, 0.0 }
 0x261   :  { %818 = vst [vmem:[%s1231_s7 + $0x18] sm:$0xf] %v562_v49  ;;  %578 = vrot.lane.b32.xlu0 %v562_v49, %s980_s17 }
 0x262   :  { %564 = vst [vmem:[%s1231_s7 + $0x8] sm:$0xf] %v560_v50  ;;  %v928_v51 = vpack.i.bf16 %v560_v50, %v559_v47 }
 0x264   :  { %929 = vrot.lane.b32.xlu1 %v928_v51, %s980_s17 }
 0x268   :  { %576 = vrot.lane.b32.xlu1 %v561_v44, %s980_s17 }
 0x2d3   :  { %v579_v58 = vpop.permute.xlu0 %578 }
 0x2d4   :  { %v587_v62 = vmax.f32 %v562_v49, %v579_v58 }
 0x2d6   :  { %v930_v59 = vpop.permute.xlu1 %929  ;;  %v598_v5 = vrot.slane %v587_v62, 1 }
 0x2d7   :  { %v932_v60 = vunpack.i.h.bf16 %v930_v59  ;;  %v931_v61 = vunpack.i.l.bf16 %v930_v59 }
 0x2d8   :  { %v607_v12 = vmax.f32 %v587_v62, %v598_v5 }
 0x2d9   :  { %v585_v63 = vmax.f32 %v560_v50, %v932_v60  ;;  %v584_v0 = vmax.f32 %v559_v47, %v931_v61 }
 0x2da   :  { %v577_v1 = vpop.permute.xlu1 %576 }
 0x2db   :  { %v594_v2 = vrot.slane %v585_v63, 1  ;;  %v593_v3 = vrot.slane %v584_v0, 1  ;;  %v586_v4 = vmax.f32 %v561_v44, %v577_v1 }
 0x2dd   :  { %v595_v6 = vsel %vm63_vm1, %v593_v3, %v594_v2  ;;  %v596_v7 = vrot.slane %v586_v4, 1 }
 0x2de   :  { %v604_v13 = vmax.f32 %v584_v0, %v595_v6 }
 0x2df   :  { %v597_v10 = vsel %vm63_vm1, %v594_v2, %v596_v7  ;;  %v599_v11 = vsel %vm63_vm1, %v596_v7, %v598_v5 }
 0x2e0   :  { %v605_v14 = vmax.f32 %v585_v63, %v597_v10  ;;  %v606_v15 = vmax.f32 %v586_v4, %v599_v11 }
 0x2e2   :  { %v609_v16 = vpack.c.bf16 %v607_v12, %v606_v15  ;;  %v608_v17 = vpack.c.bf16 %v605_v14, %v604_v13 }
 0x2e4   :  { %899 = vmatpush3.bf16.msra.mxu1 %v608_v17  ;;  %v626_v19 = vand.u32 %v624_v18, %v609_v16 }
 0x2e5   :  { %900 = vmatprep.subr.bf16.mxu1 %v981_v52 }
 0x2e8   :  { %901 = vmatpush3.bf16.msra.mxu1 %v626_v19 }
 0x2eb   :  { %903 = vmatmul.mubr.msk.bf16.vlgmr.msra.gmra.mrb[12].mxu1 %vm617_vm6, %v971_v20 }
 0x3be   :  { %v662_v23 = vpop.f32.mrb[12].mxu1 }
 0x3bf   :  { %v904_v24 = vpop.f32.mrb[13].mxu1 }
 0x3c0   :  { %v665_v25 = vpop.f32.mrb[14].mxu1 }
 0x3c1   :  { %v669_v26 = vpack.c.bf16 %v665_v25, %v662_v23  ;;  %v905_v27 = vpop.f32.mrb[15].mxu1 }
 0x3c3   :  { %919 = vmatmul.mubr.msk.bf16.vlgmr.msra.gmra.mrb[8].mxu0 %vm714_vm8, %v669_v26 }
 0x496   :  { %v756_v28 = vpop.f32.mrb[8].mxu0 }
 0x497   :  { %763 = vst [vmem:[%s1234_s8] sm:$0x3f] %v756_v28  ;;  %828 = vst [vmem:[%s1234_s8 + $0x2] sm:$0xc0] %v756_v28  ;;  %v920_v29 = vpop.f32.mrb[9].mxu0 }
 0x498   :  { %v759_v30 = vpop.f32.mrb[10].mxu0 }
 0x499   :  { %829 = vst [vmem:[%s1234_s8 + $0xa] sm:$0xf] %v759_v30  ;;  %v921_v31 = vpop.f32.mrb[11].mxu0 }

</bundles_post_ra>
